<compile_context>
chip_gen: v7x
topology: tpu7x:2x2x1
jax: 0.10.0
libtpu: 0.0.40
codegen_flags: <defaults>
</compile_context>

<pallas_src>
from functools import partial

import jax
import jax.numpy as jnp
from jax import lax
from jax.experimental import pallas as pl
from jax.experimental.pallas import tpu as pltpu

# Statically unroll the per-class loops up to this many classes; above it a
# lax.fori_loop keeps vreg live ranges flat (large-C semantic segmentation).
_UNROLL_CLASS_LIMIT = 16


def _emix_kernel(logit_ref, target_ref, out_ref, facc_ref, iacc_ref, *,
                 C, rows_tile, P, num_r, npr, alpha, gamma,
                 needs_mask, has_idle):
    h = pl.program_id(1)          # spatial chunk (core-parallel axis)
    r = pl.program_id(2)          # rows-tile within the chunk (reduction axis)
    global_r = h * npr + r

    @pl.when(r == 0)
    def _init():
        facc_ref[...] = jnp.zeros_like(facc_ref)
        iacc_ref[...] = jnp.zeros_like(iacc_ref)

    def accumulate(masked):
        t = target_ref[...]                                   # (rows_tile, 128) int32

        if masked:
            row = lax.broadcasted_iota(jnp.int32, (rows_tile, 128), 0)
            lane = lax.broadcasted_iota(jnp.int32, (rows_tile, 128), 1)
            pos = (global_r * rows_tile + row) * 128 + lane
            valid = pos < P
            validf = valid.astype(jnp.float32)

        def load(c):
            x = logit_ref[c].astype(jnp.float32)
            if masked:
                # Ragged boundary blocks hold unspecified data; zero it so exp()
                # stays finite (the maps are re-masked before accumulation).
                x = jnp.where(valid, x, 0.0)
            return x

        zeros = jnp.zeros((rows_tile, 128), jnp.float32)

        # ---- softmax statistics + target-class gather (reload logits from VMEM
        # per pass instead of keeping 2C tiles live) ----
        if C <= _UNROLL_CLASS_LIMIT:
            m = load(0)
            for c in range(1, C):
                m = jnp.maximum(m, load(c))
            sum_e, sel_e, sum_xm = zeros, zeros, zeros
            for c in range(C):
                xm = load(c) - m
                e = jnp.exp(xm)
                sum_e = sum_e + e
                sel_e = jnp.where(t == c, e, sel_e)
                sum_xm = sum_xm + xm
        else:
            m = lax.fori_loop(1, C, lambda c, acc: jnp.maximum(acc, load(c)),
                              load(0), unroll=2)

            def body(c, carry):
                sum_e, sel_e, sum_xm = carry
                xm = load(c) - m
                e = jnp.exp(xm)
                return (sum_e + e, jnp.where(t == c, e, sel_e), sum_xm + xm)

            sum_e, sel_e, sum_xm = lax.fori_loop(
                0, C, body, (zeros, zeros, zeros), unroll=2)

        inv_sum = pl.reciprocal(sum_e)                 # exact
        s_t = sel_e * inv_sum                          # target-class softmax prob
        log_st = jnp.log(s_t + 1e-8)                   # matches reference log(s+eps)
        # (1 - (s+1e-8))^gamma == exp(gamma*log(...)); NaN when softmax saturates,
        # exactly like torch.pow(negative, 1.1) in the PyTorch reference.
        w_t = jnp.exp(gamma * jnp.log(1.0 - s_t - 1e-8))
        focal = (-alpha) * w_t * log_st

        # 1e-6 one-hot background leak: sum_c -alpha*w_c*log(s_c) with w_c ~= 1;
        # log(s_c) via the log-softmax identity (one extra log total, not per class).
        log_sum = jnp.log(sum_e)
        sum_log_s = sum_xm - C * log_sum
        focal = focal + (alpha * 1e-6) * (-sum_log_s)

        # dice intersection closed form: sum_c (1[t==c]+1e-6)*s_c = s_t + 1e-6
        inter = s_t + 1e-6

        if masked:
            focal = focal * validf
            inter = inter * validf

        # Sublane/cross-vreg reduce on the otherwise-idle XLU: one vreg store per
        # step instead of rows/8 full-tile accumulator stores.
        facc_ref[...] += jnp.sum(focal, axis=0, keepdims=True)
        iacc_ref[...] += jnp.sum(inter, axis=0, keepdims=True)

    def do_tile():
        if not needs_mask:
            accumulate(masked=False)
        else:
            is_last = global_r == num_r - 1

            @pl.when(jnp.logical_not(is_last))
            def _():
                accumulate(masked=False)

            @pl.when(is_last)
            def _():
                accumulate(masked=True)

    if has_idle:
        # Odd spatial split: the tail step of the second chunk is a no-op.
        @pl.when(global_r < num_r)
        def _():
            do_tile()
    else:
        do_tile()

    @pl.when(r == npr - 1)
    def _finalize():
        out_ref[0, 0, 0] = jnp.sum(facc_ref[...])      # per-(sample, chunk) focal sum
        out_ref[0, 0, 1] = jnp.sum(iacc_ref[...])      # per-(sample, chunk) intersection


def enhanced_mixing_loss(logit_nchw, target_nhw, *, gamma=1.1, alpha=0.48):
    """loss = mean(focal) - log(mean(dice)), reduction='mean' (matches PyTorch)."""
    N, C, H, W = logit_nchw.shape
    P = H * W

    logit = logit_nchw.reshape(N, C, P)
    target = target_nhw.reshape(N, P).astype(jnp.int32)

    # Pad only up to the next multiple of 128 lanes; when P % 128 == 0 the
    # reshape below is copy-free and nothing is padded in HBM.
    P128 = pl.cdiv(P, 128) * 128
    if P128 != P:
        # TODO(synk): a flat-lane BlockSpec could avoid this copy for P % 128 != 0.
        logit = jnp.pad(logit, ((0, 0), (0, 0), (0, P128 - P)))
        target = jnp.pad(target, ((0, 0), (0, P128 - P)))
    R = P128 // 128
    logit = logit.reshape(N, C, R, 128)
    target = target.reshape(N, R, 128)

    # Rows per spatial tile: biggest tile whose double-buffered blocks + f32
    # temps stay well inside every generation's VMEM (v7x: 64 MiB physical,
    # 32 MiB scoped default), capped at 512 rows (64Ki pixels / step).
    itemsize = jnp.dtype(logit_nchw.dtype).itemsize
    bytes_per_row = 128 * (2 * C * itemsize + 2 * 4 + 8 * 4)
    max_rows = max(8, min(512, (20 * 1024 * 1024) // bytes_per_row))
    if R <= max_rows:
        rows_tile = R                        # full extent (allowed even if not %8)
    else:
        rows_tile = (max_rows // 8) * 8      # multiple of 8 sublanes
        # Prefer a divisor of R (within 2x of the budget) so no tile is ragged.
        for cand in range(rows_tile, max(rows_tile // 2, 8) - 1, -8):
            if R % cand == 0:
                rows_tile = cand
                break
    num_r = pl.cdiv(R, rows_tile)
    needs_mask = num_r * rows_tile * 128 != P

    # v7x has two TensorCores: expose a second "parallel" axis over spatial
    # chunks so small / odd batch sizes still use both cores.  Skip the split
    # when it would mostly add idle steps with redundant DMAs.
    n_split = 2 if (num_r >= 2 and (num_r % 2 == 0 or num_r >= 8)) else 1
    npr = pl.cdiv(num_r, n_split)
    has_idle = n_split * npr != num_r

    if has_idle:
        def r_map(h, r):
            return jnp.minimum(h * npr + r, num_r - 1)
    else:
        def r_map(h, r):
            return h * npr + r

    kernel = partial(_emix_kernel, C=C, rows_tile=rows_tile, P=P,
                     num_r=num_r, npr=npr, alpha=float(alpha),
                     gamma=float(gamma), needs_mask=needs_mask,
                     has_idle=has_idle)

    sums = pl.pallas_call(
        kernel,
        out_shape=jax.ShapeDtypeStruct((N, n_split, 2), jnp.float32),
        grid_spec=pltpu.PrefetchScalarGridSpec(
            num_scalar_prefetch=0,
            grid=(N, n_split, npr),
            in_specs=[
                # batch (and chunk) dims squeezed out of the kernel refs
                pl.BlockSpec((None, C, rows_tile, 128),
                             lambda n, h, r: (n, 0, r_map(h, r), 0)),
                pl.BlockSpec((None, rows_tile, 128),
                             lambda n, h, r: (n, r_map(h, r), 0)),
            ],
            out_specs=pl.BlockSpec((1, 1, 2), lambda n, h, r: (n, h, 0),
                                   memory_space=pltpu.MemorySpace.SMEM),
            scratch_shapes=[
                pltpu.VMEM((1, 128), jnp.float32),   # focal accumulator
                pltpu.VMEM((1, 128), jnp.float32),   # intersection accumulator
            ],
        ),
        compiler_params=pltpu.CompilerParams(
            dimension_semantics=("parallel", "parallel", "arbitrary"),
            vmem_limit_bytes=32 * 1024 * 1024,
        ),
    )(logit, target)

    focal_sum = jnp.sum(sums[..., 0], axis=1)        # (N,) combine core chunks
    inter_sum = jnp.sum(sums[..., 1], axis=1)        # (N,)
    focal_mean = jnp.mean(focal_sum) / P
    # closed-form cardinality: softmax and one-hot columns each sum to 1.
    card = P * (2.0 + C * 1e-6)
    dice = 1.0 - 2.0 * inter_sum / (card + 1e-8)
    return focal_mean - jnp.log(jnp.mean(dice))


def _reference_loss(logit, target, *, gamma=1.1, alpha=0.48):
    """Pure-JAX reference mirroring the PyTorch forward."""
    C = logit.shape[1]
    lf = logit.astype(jnp.float32)
    s = jax.nn.softmax(lf, axis=1)
    oh = jax.nn.one_hot(target, C, axis=1, dtype=jnp.float32) + 1e-6
    sf = s + 1e-8
    focal = -alpha * jnp.power(1.0 - sf, gamma) * jnp.log(sf)
    fl = jnp.mean(jnp.mean(jnp.sum(oh * focal, axis=1), axis=(1, 2)))
    inter = jnp.sum(s * oh, axis=(1, 2, 3))
    card = jnp.sum(s + oh, axis=(1, 2, 3))
    dice = jnp.mean(1.0 - 2.0 * inter / (card + 1e-8))
    return fl - jnp.log(dice)


if __name__ == "__main__":
    key = jax.random.PRNGKey(0)

    # Case 1: lane-aligned spatial size (zero-copy path).
    N, C, H, W = 2, 4, 16, 16
    k1, k2, k3, k4 = jax.random.split(key, 4)
    logit = jax.random.normal(k1, (N, C, H, W), dtype=jnp.float32)
    target = jax.random.randint(k2, (N, H, W), 0, C, dtype=jnp.int32)
    out = jax.block_until_ready(enhanced_mixing_loss(logit, target, gamma=1.1, alpha=0.48))
    ref = _reference_loss(logit, target, gamma=1.1, alpha=0.48)
    assert jnp.allclose(out, ref, atol=1e-5, rtol=1e-5), (out, ref)

    # Case 2: unaligned spatial size (exercises the masked final tile).
    N2, C2, H2, W2 = 2, 4, 9, 9
    logit2 = jax.random.normal(k3, (N2, C2, H2, W2), dtype=jnp.float32)
    target2 = jax.random.randint(k4, (N2, H2, W2), 0, C2, dtype=jnp.int32)
    out2 = jax.block_until_ready(enhanced_mixing_loss(logit2, target2, gamma=1.1, alpha=0.48))
    ref2 = _reference_loss(logit2, target2, gamma=1.1, alpha=0.48)
    assert jnp.allclose(out2, ref2, atol=1e-5, rtol=1e-5), (out2, ref2)

    print("KERNEL_OK")
</pallas_src>

<mosaic_0001>
module attributes {stable_mosaic.version = 11 : i64} {
  func.func @_emix_kernel(%arg0: i32, %arg1: i32, %arg2: i32, %arg3: memref<1x4x2x128xf32, #tpu.memory_space<vmem>>, %arg4: memref<1x2x128xi32, #tpu.memory_space<vmem>>, %arg5: memref<1x1x2xf32, #tpu.memory_space<smem>>, %arg6: memref<1x128xf32, #tpu.memory_space<vmem>>, %arg7: memref<1x128xf32, #tpu.memory_space<vmem>>) attributes {dimension_semantics = [#tpu.dimension_semantics<parallel>, #tpu.dimension_semantics<parallel>, #tpu.dimension_semantics<arbitrary>], iteration_bounds = array<i64: 2, 1, 1>, scalar_prefetch = 0 : i64, scratch_operands = 2 : i64, tpu.core_type = #tpu.core_type<tc>, window_params = [{transform_indices = @transform_0, window_bounds = array<i64: 1, 4, 2, 128>}, {transform_indices = @transform_1, window_bounds = array<i64: 1, 2, 128>}, {transform_indices = @transform_2, window_bounds = array<i64: 1, 1, 2>}]} {
    %c0_i32 = arith.constant 0 : i32
    %0 = arith.cmpi eq, %arg2, %c0_i32 : i32
    %1 = arith.extui %0 : i1 to i32
    %c0_i32_0 = arith.constant 0 : i32
    %2 = arith.cmpi ne, %1, %c0_i32_0 : i32
    scf.if %2 {
      %cst_54 = arith.constant 0.000000e+00 : f32
      %93 = vector.broadcast %cst_54 : f32 to vector<1x128xf32>
      %c0_55 = arith.constant 0 : index
      %c0_56 = arith.constant 0 : index
      %94 = vector.load %arg6[%c0_55, %c0_56] : memref<1x128xf32, #tpu.memory_space<vmem>>, vector<1x128xf32>
      tpu.vector_store %arg6[%c0_55, %c0_56], %93 {strides = array<i32>} : memref<1x128xf32, #tpu.memory_space<vmem>>, vector<1x128xf32>,
      %cst_57 = arith.constant 0.000000e+00 : f32
      %95 = vector.broadcast %cst_57 : f32 to vector<1x128xf32>
      %c0_58 = arith.constant 0 : index
      %c0_59 = arith.constant 0 : index
      %96 = vector.load %arg7[%c0_58, %c0_59] : memref<1x128xf32, #tpu.memory_space<vmem>>, vector<1x128xf32>
      tpu.vector_store %arg7[%c0_58, %c0_59], %95 {strides = array<i32>} : memref<1x128xf32, #tpu.memory_space<vmem>>, vector<1x128xf32>,
    } else {
    }
    %c0 = arith.constant 0 : index
    %c0_1 = arith.constant 0 : index
    %c0_2 = arith.constant 0 : index
    %3 = vector.load %arg4[%c0, %c0_1, %c0_2] : memref<1x2x128xi32, #tpu.memory_space<vmem>>, vector<1x2x128xi32>
    %4 = vector.shape_cast %3 : vector<1x2x128xi32> to vector<2x128xi32>
    %cst = arith.constant 0.000000e+00 : f32
    %5 = vector.broadcast %cst : f32 to vector<2x128xf32>
    %c0_3 = arith.constant 0 : index
    %c0_4 = arith.constant 0 : index
    %c0_5 = arith.constant 0 : index
    %c0_6 = arith.constant 0 : index
    %6 = vector.load %arg3[%c0_3, %c0_4, %c0_5, %c0_6] : memref<1x4x2x128xf32, #tpu.memory_space<vmem>>, vector<1x1x2x128xf32>
    %7 = vector.shape_cast %6 : vector<1x1x2x128xf32> to vector<2x128xf32>
    %c0_7 = arith.constant 0 : index
    %c1 = arith.constant 1 : index
    %c0_8 = arith.constant 0 : index
    %c0_9 = arith.constant 0 : index
    %8 = vector.load %arg3[%c0_7, %c1, %c0_8, %c0_9] : memref<1x4x2x128xf32, #tpu.memory_space<vmem>>, vector<1x1x2x128xf32>
    %9 = vector.shape_cast %8 : vector<1x1x2x128xf32> to vector<2x128xf32>
    %10 = arith.maximumf %7, %9 : vector<2x128xf32>
    %c0_10 = arith.constant 0 : index
    %c2 = arith.constant 2 : index
    %c0_11 = arith.constant 0 : index
    %c0_12 = arith.constant 0 : index
    %11 = vector.load %arg3[%c0_10, %c2, %c0_11, %c0_12] : memref<1x4x2x128xf32, #tpu.memory_space<vmem>>, vector<1x1x2x128xf32>
    %12 = vector.shape_cast %11 : vector<1x1x2x128xf32> to vector<2x128xf32>
    %13 = arith.maximumf %10, %12 : vector<2x128xf32>
    %c0_13 = arith.constant 0 : index
    %c3 = arith.constant 3 : index
    %c0_14 = arith.constant 0 : index
    %c0_15 = arith.constant 0 : index
    %14 = vector.load %arg3[%c0_13, %c3, %c0_14, %c0_15] : memref<1x4x2x128xf32, #tpu.memory_space<vmem>>, vector<1x1x2x128xf32>
    %15 = vector.shape_cast %14 : vector<1x1x2x128xf32> to vector<2x128xf32>
    %16 = arith.maximumf %13, %15 : vector<2x128xf32>
    %c0_16 = arith.constant 0 : index
    %c0_17 = arith.constant 0 : index
    %c0_18 = arith.constant 0 : index
    %c0_19 = arith.constant 0 : index
    %17 = vector.load %arg3[%c0_16, %c0_17, %c0_18, %c0_19] : memref<1x4x2x128xf32, #tpu.memory_space<vmem>>, vector<1x1x2x128xf32>
    %18 = vector.shape_cast %17 : vector<1x1x2x128xf32> to vector<2x128xf32>
    %19 = arith.subf %18, %16 : vector<2x128xf32>
    %20 = math.exp %19 : vector<2x128xf32>
    %21 = arith.addf %5, %20 : vector<2x128xf32>
    %c0_i32_20 = arith.constant 0 : i32
    %22 = vector.broadcast %c0_i32_20 : i32 to vector<2x128xi32>
    %23 = arith.cmpi eq, %4, %22 : vector<2x128xi32>
    %24 = arith.select %23, %20, %5 : vector<2x128xi1>, vector<2x128xf32>
    %25 = arith.addf %5, %19 : vector<2x128xf32>
    %c0_21 = arith.constant 0 : index
    %c1_22 = arith.constant 1 : index
    %c0_23 = arith.constant 0 : index
    %c0_24 = arith.constant 0 : index
    %26 = vector.load %arg3[%c0_21, %c1_22, %c0_23, %c0_24] : memref<1x4x2x128xf32, #tpu.memory_space<vmem>>, vector<1x1x2x128xf32>
    %27 = vector.shape_cast %26 : vector<1x1x2x128xf32> to vector<2x128xf32>
    %28 = arith.subf %27, %16 : vector<2x128xf32>
    %29 = math.exp %28 : vector<2x128xf32>
    %30 = arith.addf %21, %29 : vector<2x128xf32>
    %c1_i32 = arith.constant 1 : i32
    %31 = vector.broadcast %c1_i32 : i32 to vector<2x128xi32>
    %32 = arith.cmpi eq, %4, %31 : vector<2x128xi32>
    %33 = arith.select %32, %29, %24 : vector<2x128xi1>, vector<2x128xf32>
    %34 = arith.addf %25, %28 : vector<2x128xf32>
    %c0_25 = arith.constant 0 : index
    %c2_26 = arith.constant 2 : index
    %c0_27 = arith.constant 0 : index
    %c0_28 = arith.constant 0 : index
    %35 = vector.load %arg3[%c0_25, %c2_26, %c0_27, %c0_28] : memref<1x4x2x128xf32, #tpu.memory_space<vmem>>, vector<1x1x2x128xf32>
    %36 = vector.shape_cast %35 : vector<1x1x2x128xf32> to vector<2x128xf32>
    %37 = arith.subf %36, %16 : vector<2x128xf32>
    %38 = math.exp %37 : vector<2x128xf32>
    %39 = arith.addf %30, %38 : vector<2x128xf32>
    %c2_i32 = arith.constant 2 : i32
    %40 = vector.broadcast %c2_i32 : i32 to vector<2x128xi32>
    %41 = arith.cmpi eq, %4, %40 : vector<2x128xi32>
    %42 = arith.select %41, %38, %33 : vector<2x128xi1>, vector<2x128xf32>
    %43 = arith.addf %34, %37 : vector<2x128xf32>
    %c0_29 = arith.constant 0 : index
    %c3_30 = arith.constant 3 : index
    %c0_31 = arith.constant 0 : index
    %c0_32 = arith.constant 0 : index
    %44 = vector.load %arg3[%c0_29, %c3_30, %c0_31, %c0_32] : memref<1x4x2x128xf32, #tpu.memory_space<vmem>>, vector<1x1x2x128xf32>
    %45 = vector.shape_cast %44 : vector<1x1x2x128xf32> to vector<2x128xf32>
    %46 = arith.subf %45, %16 : vector<2x128xf32>
    %47 = math.exp %46 : vector<2x128xf32>
    %48 = arith.addf %39, %47 : vector<2x128xf32>
    %c3_i32 = arith.constant 3 : i32
    %49 = vector.broadcast %c3_i32 : i32 to vector<2x128xi32>
    %50 = arith.cmpi eq, %4, %49 : vector<2x128xi32>
    %51 = arith.select %50, %47, %42 : vector<2x128xi1>, vector<2x128xf32>
    %52 = arith.addf %43, %46 : vector<2x128xf32>
    %53 = tpu.reciprocal %48 : vector<2x128xf32> -> vector<2x128xf32>
    %54 = arith.mulf %51, %53 : vector<2x128xf32>
    %cst_33 = arith.constant 9.99999993E-9 : f32
    %55 = vector.broadcast %cst_33 : f32 to vector<2x128xf32>
    %56 = arith.addf %54, %55 : vector<2x128xf32>
    %57 = math.log %56 : vector<2x128xf32>
    %cst_34 = arith.constant 1.000000e+00 : f32
    %58 = vector.broadcast %cst_34 : f32 to vector<2x128xf32>
    %59 = arith.subf %58, %54 : vector<2x128xf32>
    %cst_35 = arith.constant 9.99999993E-9 : f32
    %60 = vector.broadcast %cst_35 : f32 to vector<2x128xf32>
    %61 = arith.subf %59, %60 : vector<2x128xf32>
    %62 = math.log %61 : vector<2x128xf32>
    %cst_36 = arith.constant 1.100000e+00 : f32
    %63 = vector.broadcast %cst_36 : f32 to vector<2x128xf32>
    %64 = arith.mulf %63, %62 : vector<2x128xf32>
    %65 = math.exp %64 : vector<2x128xf32>
    %cst_37 = arith.constant -4.800000e-01 : f32
    %66 = vector.broadcast %cst_37 : f32 to vector<2x128xf32>
    %67 = arith.mulf %66, %65 : vector<2x128xf32>
    %68 = arith.mulf %67, %57 : vector<2x128xf32>
    %69 = math.log %48 : vector<2x128xf32>
    %cst_38 = arith.constant 4.000000e+00 : f32
    %70 = vector.broadcast %cst_38 : f32 to vector<2x128xf32>
    %71 = arith.mulf %70, %69 : vector<2x128xf32>
    %72 = arith.subf %52, %71 : vector<2x128xf32>
    %cst_39 = arith.constant 0.000000e+00 : f32
    %73 = vector.broadcast %cst_39 : f32 to vector<2x128xf32>
    %74 = arith.subf %73, %72 : vector<2x128xf32>
    %cst_40 = arith.constant 4.800000e-07 : f32
    %75 = vector.broadcast %cst_40 : f32 to vector<2x128xf32>
    %76 = arith.mulf %75, %74 : vector<2x128xf32>
    %77 = arith.addf %68, %76 : vector<2x128xf32>
    %cst_41 = arith.constant 9.99999997E-7 : f32
    %78 = vector.broadcast %cst_41 : f32 to vector<2x128xf32>
    %79 = arith.addf %54, %78 : vector<2x128xf32>
    %c0_42 = arith.constant 0 : index
    %c0_43 = arith.constant 0 : index
    %80 = vector.load %arg6[%c0_42, %c0_43] : memref<1x128xf32, #tpu.memory_space<vmem>>, vector<1x128xf32>
    %cst_44 = arith.constant dense<0.000000e+00> : vector<128xf32>
    %81 = vector.multi_reduction <add>, %77, %cst_44 [0] : vector<2x128xf32> to vector<128xf32>
    %82 = vector.shape_cast %81 : vector<128xf32> to vector<1x128xf32>
    %83 = arith.addf %80, %82 : vector<1x128xf32>
    %c0_45 = arith.constant 0 : index
    %c0_46 = arith.constant 0 : index
    %84 = vector.load %arg6[%c0_45, %c0_46] : memref<1x128xf32, #tpu.memory_space<vmem>>, vector<1x128xf32>
    tpu.vector_store %arg6[%c0_45, %c0_46], %83 {strides = array<i32>} : memref<1x128xf32, #tpu.memory_space<vmem>>, vector<1x128xf32>,
    %c0_47 = arith.constant 0 : index
    %c0_48 = arith.constant 0 : index
    %85 = vector.load %arg7[%c0_47, %c0_48] : memref<1x128xf32, #tpu.memory_space<vmem>>, vector<1x128xf32>
    %cst_49 = arith.constant dense<0.000000e+00> : vector<128xf32>
    %86 = vector.multi_reduction <add>, %79, %cst_49 [0] : vector<2x128xf32> to vector<128xf32>
    %87 = vector.shape_cast %86 : vector<128xf32> to vector<1x128xf32>
    %88 = arith.addf %85, %87 : vector<1x128xf32>
    %c0_50 = arith.constant 0 : index
    %c0_51 = arith.constant 0 : index
    %89 = vector.load %arg7[%c0_50, %c0_51] : memref<1x128xf32, #tpu.memory_space<vmem>>, vector<1x128xf32>
    tpu.vector_store %arg7[%c0_50, %c0_51], %88 {strides = array<i32>} : memref<1x128xf32, #tpu.memory_space<vmem>>, vector<1x128xf32>,
    %c0_i32_52 = arith.constant 0 : i32
    %90 = arith.cmpi eq, %arg2, %c0_i32_52 : i32
    %91 = arith.extui %90 : i1 to i32
    %c0_i32_53 = arith.constant 0 : i32
    %92 = arith.cmpi ne, %91, %c0_i32_53 : i32
    scf.if %92 {
      %c0_54 = arith.constant 0 : index
      %c0_55 = arith.constant 0 : index
      %93 = vector.load %arg6[%c0_54, %c0_55] : memref<1x128xf32, #tpu.memory_space<vmem>>, vector<1x128xf32>
      %94 = vector.shape_cast %93 : vector<1x128xf32> to vector<1x1x128xf32>
      %cst_56 = arith.constant dense<0.000000e+00> : vector<1xf32>
      %95 = vector.multi_reduction <add>, %94, %cst_56 [1, 2] : vector<1x1x128xf32> to vector<1xf32>
      %96 = vector.shape_cast %95 : vector<1xf32> to vector<1x1x1xf32>
      %97 = vector.extract %96[0, 0, 0] : f32 from vector<1x1x1xf32>
      %c0_57 = arith.constant 0 : index
      %c0_58 = arith.constant 0 : index
      %c0_59 = arith.constant 0 : index
      %98 = memref.load %arg5[%c0_57, %c0_58, %c0_59] : memref<1x1x2xf32, #tpu.memory_space<smem>>
      memref.store %97, %arg5[%c0_57, %c0_58, %c0_59] : memref<1x1x2xf32, #tpu.memory_space<smem>>
      %c0_60 = arith.constant 0 : index
      %c0_61 = arith.constant 0 : index
      %99 = vector.load %arg7[%c0_60, %c0_61] : memref<1x128xf32, #tpu.memory_space<vmem>>, vector<1x128xf32>
      %100 = vector.shape_cast %99 : vector<1x128xf32> to vector<1x1x128xf32>
      %cst_62 = arith.constant dense<0.000000e+00> : vector<1xf32>
      %101 = vector.multi_reduction <add>, %100, %cst_62 [1, 2] : vector<1x1x128xf32> to vector<1xf32>
      %102 = vector.shape_cast %101 : vector<1xf32> to vector<1x1x1xf32>
      %103 = vector.extract %102[0, 0, 0] : f32 from vector<1x1x1xf32>
      %c0_63 = arith.constant 0 : index
      %c0_64 = arith.constant 0 : index
      %c1_65 = arith.constant 1 : index
      %104 = memref.load %arg5[%c0_63, %c0_64, %c1_65] : memref<1x1x2xf32, #tpu.memory_space<smem>>
      memref.store %103, %arg5[%c0_63, %c0_64, %c1_65] : memref<1x1x2xf32, #tpu.memory_space<smem>>
    } else {
    }
    return
  }
  func.func @transform_0(%arg0: i32, %arg1: i32, %arg2: i32) -> (i32, i32, i32, i32) {
    %c1_i32 = arith.constant 1 : i32
    %0 = arith.muli %arg1, %c1_i32 : i32
    %1 = arith.addi %0, %arg2 : i32
    %c0_i32 = arith.constant 0 : i32
    %c0_i32_0 = arith.constant 0 : i32
    %c0_i32_1 = arith.constant 0 : i32
    return %arg0, %c0_i32, %1, %c0_i32_0 : i32, i32, i32, i32
  }
  func.func @transform_1(%arg0: i32, %arg1: i32, %arg2: i32) -> (i32, i32, i32) {
    %c1_i32 = arith.constant 1 : i32
    %0 = arith.muli %arg1, %c1_i32 : i32
    %1 = arith.addi %0, %arg2 : i32
    %c0_i32 = arith.constant 0 : i32
    %c0_i32_0 = arith.constant 0 : i32
    return %arg0, %1, %c0_i32 : i32, i32, i32
  }
  func.func @transform_2(%arg0: i32, %arg1: i32, %arg2: i32) -> (i32, i32, i32) {
    %c0_i32 = arith.constant 0 : i32
    %c0_i32_0 = arith.constant 0 : i32
    return %arg0, %arg1, %c0_i32 : i32, i32, i32
  }
}

</mosaic_0001>

<bundles_post_ra>
// kernel: tpu_custom_call.1
= control target key start
LH: loop header
LB: loop body
LE: loop exit
PB: predicated region body
PF: predicated region fallthrough
CT: control target
= control target key end

     0   :  { %7 = vsyncpa [#allocation5], 0  ;;  %s945_s0 = inlined_call_operand.hbm [shape: f32[2,4,2,128], index: 0, kind: input, shape index: {}]   ;;  %s946_s1 = inlined_call_operand.hbm [shape: s32[2,2,128], index: 1, kind: input, shape index: {}]   ;;  %s947_s2 = inlined_call_operand.hbm [shape: f32[2,1,2], index: 2, kind: output, shape index: {}]  }
   0x1   :  { %9 = vsyncpa [#allocation5 + $0x1], 0 }
   0x2   :  { %10 = vsyncpa [#allocation8], 0 }
   0x3   :  { %12 = vsyncpa [#allocation8 + $0x1], 0 }
   0x4   :  { %13 = vsyncpa [#allocation6], 0 }
   0x5   :  { %15 = vsyncpa [#allocation6 + $0x1], 0  ;;  %s739_s9 = smov 0   ;;  %s741_s10 = smov 0  }
   0x6   :  { %s743_s11 = smov 0   ;;  %s745_s12 = smov 0  }
   0x7   :  { %s747_s13 = smov 0   ;;  %s749_s14 = smov 0  }
   0x8 LB: > { %s476_s15 = sadd.s32 4294967295, %s717_s14   ;;  %s477_s16 = sadd.s32 4294967294, %s717_s14   ;;  %s717_s14 = sphi %s749_s14, %s21_s14   ;;  %s713_s13 = sphi %s747_s13, %s968_s13   ;;  %s709_s12 = sphi %s745_s12, %s967_s12   ;;  %s705_s11 = sphi %s743_s11, %s966_s11   ;;  %s701_s10 = sphi %s741_s10, %s965_s10   ;;  %s697_s9 = sphi %s739_s9, %s964_s9  }
   0x9   : > { %s40_s17 = sadd.s32 1, %s713_s13  ;;  %s51_s18 = sadd.s32 1, %s705_s11 }
   0xa   : > { %p42_p0 = scmp.ge.s32.totalorder %s40_s17, 2  ;;  %p58_p1 = scmp.ne.s32.totalorder %s705_s11, %s701_s10 }
   0xb   : > { %p59_p2 = scmp.eq.s32.totalorder %s717_s14, 0  ;;  %p64_p3 = scmp.ne.s32.totalorder %s701_s10, %s697_s9 }
   0xc   : > { %s970_s17 = smov (%p42_p0, %s40_s17), 0  ;;  %p65_p5 = scmp.eq.s32.totalorder %s476_s15, 0 }
   0xd   : > { %p780_p4 = por %p59_p2, %p58_p1  ;;  %s46_s20 = ssub.s32 %s713_s13, %s970_s17 }
   0xe   : > { %p120_p6 = scmp.eq.s32.totalorder %s476_s15, 1  ;;  %p49_p7 = scmp.eq.s32.totalorder %s46_s20, 0 }
   0xf   : > { %p786_p8 = por %p65_p5, %p64_p3  ;;  %p126_p10 = scmp.eq.s32.totalorder %s477_s16, 1 }
  0x10   : > { %p790_p9 = por %p120_p6, %p58_p1  ;;  %p948_p12 = scmp.lt.s32.totalorder %s717_s14, 2 }
  0x11   : > { %s953_s21 = scalar_select %p786_p8, 1, 0 }
  0x12   : > { %s954_s22 = scalar_select %p790_p9, 1, 0 }
  0x13   : > { %s795_s23 = scalar_select %p49_p7, %s705_s11, %s51_s18  }
  0x14   : > { %p797_p11 = por %p126_p10, %p64_p3  ;;  %s803_s25 = sand.u32 1, %s705_s11  }
  0x15   : > { %s480_s26 = sshll.u32 %s803_s25, 3  ;;  %s497_s27 = sshll.u32 %s713_s13, 7 }
  0x16   : > { %s955_s24 = scalar_select %p797_p11, 1, 0 }
  0x17   : > { %s810_s30 = scalar_lea.hbm %s945_s0, %s497_s27  ;;  %s150_s3 = scalar_lea.vmem [#allocation4], %s480_s26 }
  0x18   : > { %s159_s4 = sshll.u32 %s150_s3, 4  ;;  %p818_p13 = pnand %p948_p12, %p780_p4  ;;  %s812_s4 = int_to_ptr.vmem [resolvable:$true] %s159_s4 }
  0x19   : > { %s147_s6 = scalar_lea.sflag [#allocation5], %s803_s25  ;;  %s585_s7 = scalar_lea.hbm %s810_s30, 128 }
  0x1a   : > { %p586_p1 = scmp.ne.s32.totalorder %s810_s30, %s585_s7  ;;  %p587_p2 = pneg %p818_p13 }
  0x1b   : > { %s590_s16 = scalar_lea.hbm %s945_s0, 256  ;;  %p591_p4 = scmp.lt.u32.totalorder %s810_s30, %s945_s0 }
  0x1c   : > { %p588_p3 = pnand %p587_p2, %p586_p1  ;;  %p592_p6 = scmp.lt.u32.totalorder %s590_s16, %s585_s7 }
  0x1d   : > { %p594_p10 = scmp.lt.u32.totalorder %s585_s7, %s810_s30 }
  0x1e   : > { %p589_p5 = pneg %p588_p3  ;;  %p593_p7 = por %p592_p6, %p591_p4 }
  0x20   : > { %p595_p12 = por %p594_p10, %p593_p7 }
  0x22   : > { %p596_p0 = pnand %p595_p12, %p589_p5 }
  0x24   : > { %599 = shalt.err (!%p596_p0)
}
  0x25   : > { %s600_s20 = scalar_lea.vmem %s812_s4, 128  ;;  %s719_s26 = smov [#allocation4]  }
  0x26   : > { %p601_p1 = scmp.ne.s32.totalorder %s812_s4, %s600_s20  ;;  %s605_s27 = sshll.u32 %s719_s26, 4  ;;  %s606_s27 = int_to_ptr.vmem [resolvable:$false] %s605_s27 }
  0x27   : > { %s607_s28 = scalar_lea.vmem %s606_s27, 256  ;;  %p608_p9 = scmp.lt.s32.totalorder %s812_s4, %s606_s27 }
  0x28   : > { %p603_p3 = pnand %p601_p1, %p587_p2  ;;  %p609_p4 = scmp.lt.s32.totalorder %s607_s28, %s600_s20 }
  0x2a   : > { %p604_p11 = pneg %p603_p3  ;;  %p610_p6 = por %p609_p4, %p608_p9 }
  0x2c   : > { %p611_p7 = pnand %p610_p6, %p604_p11 }
  0x2e   : > { %614 = shalt.err (!%p611_p7)
}
  0x2f   : > { %s720_s29 = smov 32   ;;  %s721_s3 = smov 2  }
  0x30   : > { %511 = dma.hbm_to_vmem [thread:$0]  (!%p818_p13), %s810_s30, 128, %s812_s4, %s147_s6, %s720_s29, %s720_s29, %s721_s3  }
  0x31   : > { %p187_p12 = scmp.lt.s32.totalorder %s717_s14, 3  ;;  %s483_s7 = sshll.u32 %s803_s25, 1 }
  0x32   : > { %s484_s8 = sshll.u32 %s713_s13, 5  ;;  %p957_p9 = scmp.ge.s32.totalorder %s717_s14, 1 }
  0x33   : > { %s863_s19 = scalar_lea.hbm %s946_s1, %s484_s8  ;;  %s173_s20 = scalar_lea.vmem [#allocation7], %s483_s7 }
  0x34   : > { %p856_p11 = pnand %p957_p9, %p187_p12  ;;  %s182_s26 = sshll.u32 %s173_s20, 4  ;;  %s183_s26 = int_to_ptr.vmem [resolvable:$true] %s182_s26 }
  0x35   : > { %s170_s30 = scalar_lea.sflag [#allocation8], %s803_s25  ;;  %s615_s4 = scalar_lea.hbm %s863_s19, 32 }
  0x36   : > { %s958_s15 = scalar_select %p856_p11, 1, 0 }
  0x37   : > { %p616_p0 = scmp.ne.s32.totalorder %s863_s19, %s615_s4  ;;  %s620_s28 = scalar_lea.hbm %s946_s1, 64 }
  0x38   : > { %p621_p1 = scmp.lt.u32.totalorder %s863_s19, %s946_s1  ;;  %p622_p3 = scmp.lt.u32.totalorder %s620_s28, %s615_s4 }
  0x39   : > { %p618_p5 = pnand %p616_p0, %p587_p2  ;;  %p624_p6 = scmp.lt.u32.totalorder %s615_s4, %s863_s19 }
  0x3a   : > { %p623_p4 = por %p622_p3, %p621_p1 }
  0x3b   : > { %p619_p10 = pneg %p618_p5 }
  0x3c   : > { %p625_p7 = por %p624_p6, %p623_p4 }
  0x3e   : > { %p626_p12 = pnand %p625_p7, %p619_p10 }
  0x40   : > { %629 = shalt.err (!%p626_p12)
}
  0x41   : > { %s630_s25 = scalar_lea.vmem %s183_s26, 32  ;;  %s722_s7 = smov [#allocation7]  }
  0x42   : > { %p631_p9 = scmp.ne.s32.totalorder %s183_s26, %s630_s25  ;;  %s635_s8 = sshll.u32 %s722_s7, 4  ;;  %s636_s8 = int_to_ptr.vmem [resolvable:$false] %s635_s8 }
  0x43   : > { %s637_s16 = scalar_lea.vmem %s636_s8, 64  ;;  %p638_p8 = scmp.lt.s32.totalorder %s183_s26, %s636_s8 }
  0x44   : > { %p633_p0 = pnand %p631_p9, %p587_p2  ;;  %p639_p11 = scmp.lt.s32.totalorder %s637_s16, %s630_s25 }
  0x46   : > { %p634_p5 = pneg %p633_p0  ;;  %p640_p1 = por %p639_p11, %p638_p8 }
  0x48   : > { %p641_p3 = pnand %p640_p1, %p634_p5 }
  0x4a   : > { %644 = shalt.err (!%p641_p3)
}
  0x4b   : > { %514 = dma.hbm_to_vmem [thread:$0]  (!%p818_p13), %s863_s19, 32, %s183_s26, %s170_s30  }
  0x4c   : > { %p959_p10 = scmp.ne.s32.totalorder %s958_s15, 0 }
  0x4d   : > { %s888_s18 = sand.u32 (!%p959_p10), 1, %s701_s10   ;;  %p960_p2 = scmp.ne.s32.totalorder (!%p959_p10), %s953_s21, 0 }
  0x4e   : > { %191 = sbr.rel (%p959_p10) target bundleno = 404 (0x194), region = 28  ;;  %s486_s20 = sshll.u32 (!%p959_p10), %s888_s18, 3 }
  0x4f   : > { %s194_s4 = scalar_lea.sflag (!%p959_p10), [#allocation5], %s888_s18  ;;  %s197_s6 = scalar_lea.vmem (!%p959_p10), [#allocation4], %s486_s20 }
  0x55   : > { %684 = dma.done.wait (%p960_p2), %s194_s4, 128  }
  0x56   : > { %686 = vsyncadd (%p960_p2), %s194_s4, 4294967168  ;;  %s487_s5 = sshll.u32 %s888_s18, 1  ;;  %s203_s15 = scalar_lea.sflag [#allocation8], %s888_s18 }
  0x57   : > { %s206_s19 = scalar_lea.vmem [#allocation7], %s487_s5 }
  0x58   : > { %688 = dma.done.wait (%p960_p2), %s203_s15, 32  }
  0x59   : > { %690 = vsyncadd (%p960_p2), %s203_s15, 4294967264  ;;  %v723_v0 = vmov 0.0   ;;  %v241_v1 = vld [vmem:[%s197_s6] sm:$0x3]  ;;  %v489_v2 = vld [vmem:[%s197_s6 + $0x2] sm:$0x3] }
  0x5a   : > { %238 = vst [vmem:[#allocation2] sm:$0x1] %v723_v0  ;;  %239 = vst [vmem:[#allocation3] sm:$0x1] %v723_v0  ;;  %v244_v3 = vmax.f32 %v241_v1, %v489_v2  ;;  %v490_v4 = vld [vmem:[%s197_s6 + $0x4] sm:$0x3] }
  0x5b   : > { %v491_v5 = vld [vmem:[%s197_s6 + $0x6] sm:$0x3]  ;;  %v240_v18 = vld [vmem:[%s206_s19] sm:$0x3]  ;;  %vm302_vm4 = vcmask 1041408   ;;  %vm326_vm5 = vcmask 1040384  }
  0x5c   : > { %v247_v6 = vmax.f32 %v244_v3, %v490_v4  ;;  %vm255_vm0 = vcmp.eq.s32.totalorder %v240_v18, 0  ;;  %vm262_vm1 = vcmp.eq.s32.totalorder %v240_v18, 1  ;;  %vm269_vm2 = vcmp.eq.s32.totalorder %v240_v18, 2  ;;  %s488_s21 = sshll.u32 %s888_s18, 7  ;;  %s494_s30 = sshll.u32 %s709_s12, 4 }
  0x5d   : > { %vm276_vm3 = vcmp.eq.s32.totalorder %v240_v18, 3  ;;  %s231_s27 = scalar_lea.smem [#allocation9], %s488_s21  ;;  %s365_s25 = scalar_lea.hbm %s947_s2, %s494_s30 }
  0x5e   : > { %v250_v7 = vmax.f32 %v247_v6, %v491_v5  ;;  %s350_s28 = scalar_lea.smem %s231_s27, 1 [#allocation9]  ;;  %s353_s8 = scalar_lea.sflag [#allocation6], %s888_s18 }
  0x5f   : > { %s645_s16 = scalar_lea.hbm %s365_s25, 16  ;;  %p961_p13 = scmp.ne.s32.totalorder %s954_s22, 0 }
  0x60   : > { %v251_v8 = vsub.f32 %v241_v1, %v250_v7  ;;  %v258_v9 = vsub.f32 %v489_v2, %v250_v7  ;;  %v265_v10 = vsub.f32 %v490_v4, %v250_v7  ;;  %v272_v11 = vsub.f32 %v491_v5, %v250_v7  ;;  %p646_p8 = scmp.ne.s32.totalorder %s365_s25, %s645_s16  ;;  %s649_s6 = scalar_lea.hbm %s947_s2, 32 }
  0x61   : > { %v312_v40 = vld [vmem:[#allocation3] sm:$0x1]  ;;  %v301_v4 = vld [vmem:[#allocation2] sm:$0x1]  ;;  %p650_p6 = scmp.lt.u32.totalorder %s365_s25, %s947_s2  ;;  %p651_p7 = scmp.lt.u32.totalorder %s649_s6, %s645_s16 }
  0x62   : > { %v252_v12 = vmul.f32 1.442695, %v251_v8  ;;  %v259_v13 = vmul.f32 1.442695, %v258_v9  ;;  %v266_v14 = vmul.f32 1.442695, %v265_v10  ;;  %v264_v39 = vadd.f32 %v258_v9, %v251_v8  ;;  %p647_p11 = pnand %p646_p8, %p961_p13  ;;  %p653_p9 = scmp.lt.u32.totalorder %s645_s16, %s365_s25 }
  0x63   : > { %v273_v15 = vmul.f32 1.442695, %v272_v11  ;;  %p652_p12 = por %p651_p7, %p650_p6 }
  0x64   : > { %567 = vpow2.f32 %v252_v12  ;;  %v271_v47 = vadd.f32 %v265_v10, %v264_v39  ;;  %p648_p4 = pneg %p647_p11 }
  0x65   : > { %569 = vpow2.f32 %v259_v13  ;;  %p654_p0 = por %p653_p9, %p652_p12 }
  0x66   : > { %571 = vpow2.f32 %v266_v14  ;;  %v278_v51 = vadd.f32 %v272_v11, %v271_v47 }
  0x67   : > { %573 = vpow2.f32 %v273_v15  ;;  %p655_p5 = pnand %p654_p0, %p648_p4 }
  0x6e   : > { %v568_v16 = vpop.eup %567 }
  0x6f   : > { %v570_v17 = vpop.eup %569  ;;  %v256_v24 = vsel %vm255_vm0, %v568_v16, 0.0 }
  0x70   : > { %v572_v19 = vpop.eup %571  ;;  %v261_v20 = vadd.f32 %v570_v17, %v568_v16  ;;  %v263_v25 = vsel %vm262_vm1, %v570_v17, %v256_v24 }
  0x71   : > { %v574_v21 = vpop.eup %573  ;;  %v270_v26 = vsel %vm269_vm2, %v572_v19, %v263_v25 }
  0x72   : > { %v268_v22 = vadd.f32 %v572_v19, %v261_v20  ;;  %v277_v27 = vsel %vm276_vm3, %v574_v21, %v270_v26 }
  0x74   : > { %v275_v23 = vadd.f32 %v574_v21, %v268_v22 }
  0x76   : > { %575 = vrcp.f32 %v275_v23 }
  0x77   : > { %577 = vlog2.f32 %v275_v23 }
  0x80   : > { %v576_v28 = vpop.eup %575 }
  0x81   : > { %v280_v29 = vmul.f32 %v576_v28, %v277_v27  ;;  %v578_v41 = vpop.eup %577 }
  0x82   : > { %v294_v48 = vmul.f32 0.6931472, %v578_v41 }
  0x83   : > { %v284_v30 = vsub.f32 1.0, %v280_v29  ;;  %v300_v31 = vadd.f32 1e-06, %v280_v29  ;;  %v281_v42 = vadd.f32 1e-08, %v280_v29 }
  0x84   : > { %v295_v52 = vmul.f32 4.0, %v294_v48 }
  0x85   : > { %v492_v32 = vadd.f32 -1e-08, %v284_v30  ;;  %v313_v33 = vsel %vm302_vm4, %v300_v31, 0.0 }
  0x86   : > { %v314_v34 = vrot.slane %v313_v33, 4  ;;  %v296_v53 = vsub.f32 %v278_v51, %v295_v52 }
  0x87   : > { %579 = vlog2.f32 %v492_v32 }
  0x88   : > { %v315_v35 = vadd.f32 %v314_v34, %v313_v33  ;;  %581 = vlog2.f32 %v281_v42  ;;  %v297_v55 = vsub.f32 0.0, %v296_v53 }
  0x8a   : > { %v316_v36 = vrot.slane %v315_v35, 2  ;;  %v298_v59 = vmul.f32 4.8e-07, %v297_v55 }
  0x8c   : > { %v317_v37 = vadd.f32 %v316_v36, %v315_v35 }
  0x8e   : > { %v318_v38 = vrot.slane %v317_v37, 1 }
  0x90   : > { %v319_v43 = vadd.f32 %v318_v38, %v317_v37 }
  0x91   : > { %v580_v44 = vpop.eup %579 }
  0x92   : > { %v287_v45 = vmul.f32 0.6931472, %v580_v44  ;;  %v320_v46 = vadd.f32 %v319_v43, %v312_v40  ;;  %v582_v54 = vpop.eup %581 }
  0x93   : > { %v283_v56 = vmul.f32 0.6931472, %v582_v54 }
  0x94   : > { %v288_v49 = vmul.f32 1.1, %v287_v45  ;;  %321 = vst [vmem:[#allocation3] sm:$0x1] %v320_v46 }
  0x96   : > { %v289_v50 = vmul.f32 1.442695, %v288_v49 }
  0x98   : > { %583 = vpow2.f32 %v289_v50 }
  0x9b   : > { %v339_v8 = vld [vmem:[#allocation3] sm:$0x1] }
  0x9c   : > { %v340_v10 = vsel %vm326_vm5, %v339_v8, 0.0 }
  0xa2   : > { %v584_v57 = vpop.eup %583 }
  0xa3   : > { %v291_v58 = vmul.f32 -0.48, %v584_v57 }
  0xa5   : > { %v292_v60 = vmul.f32 %v291_v58, %v283_v56 }
  0xa7   : > { %v299_v61 = vadd.f32 %v298_v59, %v292_v60 }
  0xa9   : > { %v303_v62 = vsel %vm302_vm4, %v299_v61, 0.0 }
  0xaa   : > { %v304_v63 = vrot.slane %v303_v62, 4 }
  0xac   : > { %v305_v0 = vadd.f32 %v304_v63, %v303_v62 }
  0xae   : > { %v306_v1 = vrot.slane %v305_v0, 2 }
  0xb0   : > { %v307_v2 = vadd.f32 %v306_v1, %v305_v0 }
  0xb2   : > { %v308_v3 = vrot.slane %v307_v2, 1 }
  0xb4   : > { %v309_v5 = vadd.f32 %v308_v3, %v307_v2 }
  0xb6   : > { %v310_v6 = vadd.f32 %v309_v5, %v301_v4 }
  0xb8   : > { %311 = vst [vmem:[#allocation2] sm:$0x1] %v310_v6 }
  0xbf   : > { %v325_v7 = vld [vmem:[#allocation2] sm:$0x1] }
  0xc0   : > { %v327_v9 = vsel %vm326_vm5, %v325_v7, 0.0 }
  0xc1   : > { %328 = vadd.xlane.f32.xlu0 %v327_v9 }
  0xc5   : > { %341 = vadd.xlane.f32.xlu0 %v340_v10 }
 0x14e   : > { %v329_v11 = vpop.xlane.xlu0 %328 }
 0x14f   : > { %v330_v12 = vrot.slane %v329_v11, 4 }
 0x151   : > { %v331_v13 = vadd.f32 %v330_v12, %v329_v11 }
 0x152   : > { %v342_v14 = vpop.xlane.xlu0 %341 }
 0x153   : > { %v332_v15 = vrot.slane %v331_v13, 2  ;;  %v343_v16 = vrot.slane %v342_v14, 4 }
 0x155   : > { %v344_v17 = vadd.f32 %v343_v16, %v342_v14  ;;  %v333_v18 = vadd.f32 %v332_v15, %v331_v13 }
 0x157   : > { %v345_v19 = vrot.slane %v344_v17, 2  ;;  %v334_v20 = vrot.slane %v333_v18, 1 }
 0x159   : > { %v346_v21 = vadd.f32 %v345_v19, %v344_v17  ;;  %v335_v22 = vadd.f32 %v334_v20, %v333_v18 }
 0x15b   : > { %498 = vpush %v335_v22  ;;  %v347_v23 = vrot.slane %v346_v21, 1 }
 0x15d   : > { %v348_v24 = vadd.f32 %v347_v23, %v346_v21 }
 0x15f   : > { %500 = vpush %v348_v24 }
 0x18c   : > { %s499_s26 = spop %498 }
 0x18d   : > { %338 = sst [smem:[%s231_s27]] %s499_s26 }
 0x190   : > { %s501_s7 = spop %500 }
 0x191   : > { %351 = sst [smem:[%s350_s28]] %s501_s7 }
 0x192   : > { %658 = shalt.err (!%p655_p5)
}
 0x193   : > { %506 = dma.smem_to_hbm (%p961_p13), %s231_s27, 16, %s365_s25, %s353_s8  }
 0x194 PF: > { %p962_p1 = scmp.lt.s32.totalorder %s717_s14, 2 }
 0x195   : > { %s377_s18 = sand.u32 (!%p962_p1), 1, %s697_s9   ;;  %p963_p3 = scmp.ne.s32.totalorder (!%p962_p1), %s955_s24, 0 }
 0x196   : > { %372 = sbr.rel (%p962_p1) target bundleno = 416 (0x1a0), region = 52  ;;  %s378_s15 = scalar_lea.sflag (!%p962_p1), [#allocation6], %s377_s18 }
 0x19d   : > { %692 = dma.done.wait (%p963_p3), %s378_s15, 16  }
 0x19e   : > { %694 = vsyncadd (%p963_p3), %s378_s15, 4294967280 }
 0x19f   : > { %383 = sfence }
 0x1a0 PF: > { %s21_s14 = sadd.s32 1, %s717_s14   ;;  %s964_s9 = smov %s701_s10 }
 0x1a1   : > { %p18_p10 = scmp.ge.s32.totalorder %s21_s14, 4   ;;  %s965_s10 = smov %s705_s11 }
 0x1a2   : > { %s966_s11 = smov %s795_s23  ;;  %s967_s12 = smov %s713_s13 }
 0x1a3   : > { %s968_s13 = smov %s970_s17  ;;  %20 = sbr.rel (!%p18_p10) target bundleno = 8 (0x8), region = 99 }
 0x1aa   :  { %384 = vsyncpa [#allocation5], 1 }
 0x1ab   :  { %386 = vsyncpa [#allocation5 + $0x1], 1 }
 0x1ac   :  { %387 = vsyncpa [#allocation8], 1 }
 0x1ad   :  { %389 = vsyncpa [#allocation8 + $0x1], 1 }
 0x1ae   :  { %390 = vsyncpa [#allocation6], 1 }
 0x1af   :  { %392 = vsyncpa [#allocation6 + $0x1], 1 }

</bundles_post_ra>
